<compile_context>
chip_gen: v5e
topology: v5e:2x2
jax: 0.10.0
libtpu: 0.0.40
codegen_flags: <defaults>
</compile_context>

<pallas_src>
import numpy as np
import jax
import jax.numpy as jnp
from jax.experimental import pallas as pl
from jax.experimental.pallas import tpu as pltpu


def _curricular_kernel(scal_ref, x_ref, xt_ref, ce_ref, re_ref):
    # scal_ref (SMEM): [t_new, 0.5*regular, 1/temperature]
    t_new = scal_ref[0]
    half_reg = scal_ref[1]
    inv_temp = scal_ref[2]

    tm = x_ref.shape[0]          # rows in this tile (static)
    n = xt_ref.shape[1]          # 2B (static)
    b = n // 2

    # (TM, N) slab of cos_theta = clamp(X @ X^T, -1, 1): bf16 MXU, f32 accumulate.
    cos = jnp.dot(x_ref[...], xt_ref[...], preferred_element_type=jnp.float32)
    cos = jnp.clip(cos, -1.0, 1.0)

    # Global row indices of this tile and their positive-pair columns.
    row = tm * pl.program_id(0) + jax.lax.broadcasted_iota(jnp.int32, (tm, 1), 0)
    partner = jnp.where(row < b, row + b, row - b)                    # (TM, 1)
    col = jax.lax.broadcasted_iota(jnp.int32, (tm, n), 1)             # (TM, N)
    offdiag = col != row                                              # diagonal removal
    pos = col == partner                                              # positive column

    # Positive ("target") logit per row, read off the slab (exact consistency).
    tl = jnp.sum(jnp.where(pos, cos, 0.0), axis=1, keepdims=True)     # (TM, 1)

    # Hard negatives: strictly larger than the positive, diagonal excluded.
    # (The positive column itself has cos == tl, so it can never be "hard".)
    hard = (cos > tl) & offdiag

    # Shared intermediate for regularizer and curricular reweighting.
    w = cos + t_new

    # Regularizer: 0.5 * regular * sum_j w^2 over hard entries with w > 1.
    re_ref[...] = half_reg * jnp.sum(
        jnp.where(hard & (w > 1.0), w * w, 0.0), axis=1, keepdims=True)

    # Curricular re-weighting + temperature scaling; diagonal removed from softmax.
    logits = jnp.where(offdiag,
                       jnp.where(hard, cos * w, cos) * inv_temp,
                       -1e30)
    row_max = jnp.max(logits, axis=1, keepdims=True)
    lse = row_max + jnp.log(jnp.sum(jnp.exp(logits - row_max), axis=1, keepdims=True))
    # The positive column is never re-weighted, so its logit is exactly tl / temperature.
    ce_ref[...] = lse - tl * inv_temp


def _pick_tile(n, slab_budget_bytes=2 * 1024 * 1024):
    """Largest row tile that divides n and keeps the (tm, n) f32 slab small."""
    max_tm = max(8, slab_budget_bytes // (4 * n))
    for cand in (1024, 512, 256, 128, 64, 32, 16, 8):
        if cand <= max_tm and n % cand == 0:
            return cand
    return n


def curricular_loss(out_1, out_2, t_buf, momentum, regular, temperature, *, tm=None):
    """Returns (loss, t_new) matching CurricularLoss.forward (t_new = updated buffer)."""
    out_1 = out_1.astype(jnp.float32)
    out_2 = out_2.astype(jnp.float32)
    bsz, d = out_1.shape
    n = 2 * bsz

    # ---- prologue (plain JAX, O(N*D)): momentum buffer update ------------------
    # target_logit holds each paired cosine twice, so its mean equals the mean of
    # the B pair values (clamped, as in the PyTorch code).
    pair = jnp.clip(jnp.sum(out_1 * out_2, axis=1), -1.0, 1.0)
    t_new = momentum * jnp.float32(t_buf) + jnp.mean(pair) * (1.0 - momentum)

    # ---- kernel operands --------------------------------------------------------
    x = jnp.concatenate([out_1, out_2], axis=0).astype(jnp.bfloat16)   # (N, D) moving rows
    xt = x.T                                                           # (D, N) stationary, one-time transpose

    if tm is None:
        tm = _pick_tile(n)
    assert n % tm == 0, (n, tm)
    n_blocks = n // tm

    scalars = jnp.stack([
        t_new.astype(jnp.float32),
        jnp.float32(0.5 * regular),
        jnp.float32(1.0 / temperature),
    ])

    # Explicit scoped-VMEM budget: double-buffered bf16 row tiles + resident X^T +
    # the live (TM, N) f32 slabs (generous headroom for intermediates), capped at
    # 64 MiB (v7x per-TC VMEM).
    slab_bytes = tm * n * 4
    operand_bytes = 2 * (tm * d * 2) + 2 * (d * n * 2) + 4 * tm * 4
    vmem_limit = int(min(max(operand_bytes + 12 * slab_bytes + (2 << 20), 4 << 20),
                         64 << 20))

    ce_rows, re_rows = pl.pallas_call(
        _curricular_kernel,
        out_shape=(jax.ShapeDtypeStruct((n, 1), jnp.float32),
                   jax.ShapeDtypeStruct((n, 1), jnp.float32)),
        grid=(n_blocks,),
        in_specs=[
            pl.BlockSpec(memory_space=pltpu.MemorySpace.SMEM),   # [t, 0.5*reg, 1/temp]
            pl.BlockSpec((tm, d), lambda i: (i, 0)),             # moving row tile
            pl.BlockSpec((d, n), lambda i: (0, 0)),              # stationary X^T
        ],
        out_specs=(pl.BlockSpec((tm, 1), lambda i: (i, 0)),
                   pl.BlockSpec((tm, 1), lambda i: (i, 0))),
        compiler_params=pltpu.CompilerParams(
            dimension_semantics=("parallel",),
            vmem_limit_bytes=vmem_limit),
    )(scalars, x, xt)

    loss = jnp.mean(ce_rows) + jnp.sum(re_rows)
    return loss, t_new


def _torch_style_reference(out_1, out_2, t_old, momentum, regular, temperature):
    """NumPy re-implementation mirroring the PyTorch code literally (compaction + label)."""
    out = np.concatenate([out_1, out_2], 0).astype(np.float32)
    B = out_1.shape[0]
    N = 2 * B
    cos = np.clip(out @ out.T, -1.0, 1.0)
    pos = np.zeros((N, N), dtype=bool)
    for i in range(B):
        pos[i, i + B] = True
        pos[i + B, i] = True
    target_logit = cos[pos].reshape(-1, 1)
    offdiag = ~np.eye(N, dtype=bool)
    cosr = cos[offdiag].reshape(N, N - 1)
    label = np.array([i + B - 1 for i in range(B)] + [i for i in range(B)])
    t = momentum * t_old + target_logit.mean() * (1.0 - momentum)
    mask = cosr > target_logit
    hard = np.where(mask, cosr, -t)
    weight = hard + t
    regular_w = np.where(weight > 1.0, weight, 0.0)
    re = 0.5 * regular * np.sum(regular_w ** 2, axis=1)
    cosr2 = cosr.copy()
    cosr2[mask] = cosr[mask] * (t + cosr[mask])
    output = cosr2 / temperature
    row_max = output.max(axis=1, keepdims=True)
    lse = np.log(np.sum(np.exp(output - row_max), axis=1)) + row_max[:, 0]
    ce = np.mean(lse - output[np.arange(N), label])
    return ce + re.sum(), t


if __name__ == "__main__":
    key = jax.random.PRNGKey(0)
    B, D = 32, 128          # N = 2B = 64 rows
    k1, k2 = jax.random.split(key)
    out_1 = jax.random.normal(k1, (B, D), dtype=jnp.float32)
    out_2 = jax.random.normal(k2, (B, D), dtype=jnp.float32)
    # embeddings are typically L2-normalized before this loss
    out_1 = out_1 / jnp.linalg.norm(out_1, axis=1, keepdims=True)
    out_2 = out_2 / jnp.linalg.norm(out_2, axis=1, keepdims=True)

    momentum, regular, temperature = 0.9, 1.0, 0.5
    t_buf = 0.0  # register_buffer('t', torch.zeros(1))

    # step 1 (buffer t = 0), forced tm=16 so the grid has 4 steps (multi-tile path)
    loss1, t1 = curricular_loss(out_1, out_2, t_buf, momentum, regular, temperature, tm=16)
    jax.block_until_ready(loss1)
    ref_loss1, ref_t1 = _torch_style_reference(np.array(out_1), np.array(out_2),
                                               t_buf, momentum, regular, temperature)
    # bf16 gram matmul -> relax loss tolerance (cos error ~1e-3)
    np.testing.assert_allclose(float(loss1), float(ref_loss1), rtol=1e-2, atol=2e-2)
    np.testing.assert_allclose(float(t1), float(ref_t1), rtol=0, atol=1e-4)

    # step 2 (feed updated buffer back, exercising the momentum path; auto tile pick)
    loss2, t2 = curricular_loss(out_1, out_2, float(t1), momentum, regular, temperature)
    jax.block_until_ready(loss2)
    ref_loss2, _ = _torch_style_reference(np.array(out_1), np.array(out_2),
                                          float(ref_t1), momentum, regular, temperature)
    np.testing.assert_allclose(float(loss2), float(ref_loss2), rtol=1e-2, atol=2e-2)

    print("KERNEL_OK")
</pallas_src>

<mosaic_0001>
module attributes {stable_mosaic.version = 11 : i64} {
  func.func @_curricular_kernel(%arg0: i32, %arg1: memref<3xf32, #tpu.memory_space<smem>>, %arg2: memref<16x128xbf16, #tpu.memory_space<vmem>>, %arg3: memref<128x64xbf16, #tpu.memory_space<vmem>>, %arg4: memref<16x1xf32, #tpu.memory_space<vmem>>, %arg5: memref<16x1xf32, #tpu.memory_space<vmem>>) attributes {dimension_semantics = [#tpu.dimension_semantics<parallel>], iteration_bounds = array<i64: 4>, scalar_prefetch = 0 : i64, scratch_operands = 0 : i64, tpu.core_type = #tpu.core_type<tc>, window_params = [{transform_indices = @transform_0, window_bounds = array<i64: 3>}, {transform_indices = @transform_1, window_bounds = array<i64: 16, 128>}, {pipeline_mode = #tpu.pipeline_mode<synchronous>, transform_indices = @transform_2, window_bounds = array<i64: 128, 64>}, {transform_indices = @transform_3, window_bounds = array<i64: 16, 1>}, {transform_indices = @transform_4, window_bounds = array<i64: 16, 1>}]} {
    %c0 = arith.constant 0 : index
    %0 = memref.load %arg1[%c0] : memref<3xf32, #tpu.memory_space<smem>>
    %c1 = arith.constant 1 : index
    %1 = memref.load %arg1[%c1] : memref<3xf32, #tpu.memory_space<smem>>
    %c2 = arith.constant 2 : index
    %2 = memref.load %arg1[%c2] : memref<3xf32, #tpu.memory_space<smem>>
    %c0_0 = arith.constant 0 : index
    %c0_1 = arith.constant 0 : index
    %3 = vector.load %arg2[%c0_0, %c0_1] : memref<16x128xbf16, #tpu.memory_space<vmem>>, vector<16x128xbf16>
    %c0_2 = arith.constant 0 : index
    %c0_3 = arith.constant 0 : index
    %4 = vector.load %arg3[%c0_2, %c0_3] : memref<128x64xbf16, #tpu.memory_space<vmem>>, vector<128x64xbf16>
    %cst = arith.constant dense<0.000000e+00> : vector<16x64xf32>
    %5 = tpu.matmul %3, %4, %cst {dimension_numbers = #tpu.dot_dimension_numbers<[1], [0], [0], [1], [0, 0, 1, 1], [], []>} : vector<16x128xbf16>, vector<128x64xbf16>, vector<16x64xf32> -> vector<16x64xf32>
    %cst_4 = arith.constant -1.000000e+00 : f32
    %cst_5 = arith.constant 1.000000e+00 : f32
    %6 = vector.broadcast %cst_4 : f32 to vector<16x64xf32>
    %7 = arith.maximumf %6, %5 : vector<16x64xf32>
    %8 = vector.broadcast %cst_5 : f32 to vector<16x64xf32>
    %9 = arith.minimumf %8, %7 : vector<16x64xf32>
    %c16_i32 = arith.constant 16 : i32
    %10 = arith.muli %c16_i32, %arg0 : i32
    %11 = tpu.iota {dimensions = array<i32: 0>} : vector<16x1xi32>
    %12 = vector.broadcast %10 : i32 to vector<16x1xi32>
    %13 = arith.addi %12, %11 : vector<16x1xi32>
    %c32_i32 = arith.constant 32 : i32
    %14 = vector.broadcast %c32_i32 : i32 to vector<16x1xi32>
    %15 = arith.cmpi slt, %13, %14 : vector<16x1xi32>
    %c32_i32_6 = arith.constant 32 : i32
    %16 = vector.broadcast %c32_i32_6 : i32 to vector<16x1xi32>
    %17 = arith.addi %13, %16 : vector<16x1xi32>
    %c32_i32_7 = arith.constant 32 : i32
    %18 = vector.broadcast %c32_i32_7 : i32 to vector<16x1xi32>
    %19 = arith.subi %13, %18 : vector<16x1xi32>
    %20 = arith.select %15, %17, %19 : vector<16x1xi1>, vector<16x1xi32>
    %21 = tpu.iota {dimensions = array<i32: 1>} : vector<16x64xi32>
    %22 = vector.broadcast %13 : vector<16x1xi32> to vector<16x64xi32>
    %23 = arith.cmpi ne, %21, %22 : vector<16x64xi32>
    %24 = vector.broadcast %20 : vector<16x1xi32> to vector<16x64xi32>
    %25 = arith.cmpi eq, %21, %24 : vector<16x64xi32>
    %cst_8 = arith.constant 0.000000e+00 : f32
    %26 = vector.broadcast %cst_8 : f32 to vector<16x64xf32>
    %27 = arith.select %25, %9, %26 : vector<16x64xi1>, vector<16x64xf32>
    %cst_9 = arith.constant dense<0.000000e+00> : vector<16xf32>
    %28 = vector.multi_reduction <add>, %27, %cst_9 [1] : vector<16x64xf32> to vector<16xf32>
    %29 = vector.shape_cast %28 : vector<16xf32> to vector<16x1xf32>
    %30 = vector.broadcast %29 : vector<16x1xf32> to vector<16x64xf32>
    %31 = arith.cmpf ogt, %9, %30 : vector<16x64xf32>
    %32 = arith.andi %31, %23 : vector<16x64xi1>
    %33 = vector.broadcast %0 : f32 to vector<16x64xf32>
    %34 = arith.addf %9, %33 : vector<16x64xf32>
    %cst_10 = arith.constant 1.000000e+00 : f32
    %35 = vector.broadcast %cst_10 : f32 to vector<16x64xf32>
    %36 = arith.cmpf ogt, %34, %35 : vector<16x64xf32>
    %37 = arith.andi %32, %36 : vector<16x64xi1>
    %38 = arith.mulf %34, %34 : vector<16x64xf32>
    %cst_11 = arith.constant 0.000000e+00 : f32
    %39 = vector.broadcast %cst_11 : f32 to vector<16x64xf32>
    %40 = arith.select %37, %38, %39 : vector<16x64xi1>, vector<16x64xf32>
    %cst_12 = arith.constant dense<0.000000e+00> : vector<16xf32>
    %41 = vector.multi_reduction <add>, %40, %cst_12 [1] : vector<16x64xf32> to vector<16xf32>
    %42 = vector.shape_cast %41 : vector<16xf32> to vector<16x1xf32>
    %43 = vector.broadcast %1 : f32 to vector<16x1xf32>
    %44 = arith.mulf %43, %42 : vector<16x1xf32>
    %c0_13 = arith.constant 0 : index
    %c0_14 = arith.constant 0 : index
    %45 = vector.load %arg5[%c0_13, %c0_14] : memref<16x1xf32, #tpu.memory_space<vmem>>, vector<16x1xf32>
    tpu.vector_store %arg5[%c0_13, %c0_14], %44 {strides = array<i32>} : memref<16x1xf32, #tpu.memory_space<vmem>>, vector<16x1xf32>,
    %46 = arith.mulf %9, %34 : vector<16x64xf32>
    %47 = arith.select %32, %46, %9 : vector<16x64xi1>, vector<16x64xf32>
    %48 = vector.broadcast %2 : f32 to vector<16x64xf32>
    %49 = arith.mulf %47, %48 : vector<16x64xf32>
    %cst_15 = arith.constant -1.000000e+30 : f32
    %50 = vector.broadcast %cst_15 : f32 to vector<16x64xf32>
    %51 = arith.select %23, %49, %50 : vector<16x64xi1>, vector<16x64xf32>
    %cst_16 = arith.constant dense<0xFF800000> : vector<16xf32>
    %52 = vector.multi_reduction <maximumf>, %51, %cst_16 [1] : vector<16x64xf32> to vector<16xf32>
    %53 = vector.shape_cast %52 : vector<16xf32> to vector<16x1xf32>
    %54 = vector.broadcast %53 : vector<16x1xf32> to vector<16x64xf32>
    %55 = arith.subf %51, %54 : vector<16x64xf32>
    %56 = math.exp %55 : vector<16x64xf32>
    %cst_17 = arith.constant dense<0.000000e+00> : vector<16xf32>
    %57 = vector.multi_reduction <add>, %56, %cst_17 [1] : vector<16x64xf32> to vector<16xf32>
    %58 = vector.shape_cast %57 : vector<16xf32> to vector<16x1xf32>
    %59 = math.log %58 : vector<16x1xf32>
    %60 = arith.addf %53, %59 : vector<16x1xf32>
    %61 = vector.broadcast %2 : f32 to vector<16x1xf32>
    %62 = arith.mulf %29, %61 : vector<16x1xf32>
    %63 = arith.subf %60, %62 : vector<16x1xf32>
    %c0_18 = arith.constant 0 : index
    %c0_19 = arith.constant 0 : index
    %64 = vector.load %arg4[%c0_18, %c0_19] : memref<16x1xf32, #tpu.memory_space<vmem>>, vector<16x1xf32>
    tpu.vector_store %arg4[%c0_18, %c0_19], %63 {strides = array<i32>} : memref<16x1xf32, #tpu.memory_space<vmem>>, vector<16x1xf32>,
    return
  }
  func.func @transform_0(%arg0: i32) -> i32 {
    %c0_i32 = arith.constant 0 : i32
    %c0_i32_0 = arith.constant 0 : i32
    return %c0_i32 : i32
  }
  func.func @transform_1(%arg0: i32) -> (i32, i32) {
    %c0_i32 = arith.constant 0 : i32
    %c0_i32_0 = arith.constant 0 : i32
    return %arg0, %c0_i32 : i32, i32
  }
  func.func @transform_2(%arg0: i32) -> (i32, i32) {
    %c0_i32 = arith.constant 0 : i32
    %c0_i32_0 = arith.constant 0 : i32
    %c0_i32_1 = arith.constant 0 : i32
    return %c0_i32, %c0_i32_0 : i32, i32
  }
  func.func @transform_3(%arg0: i32) -> (i32, i32) {
    %c0_i32 = arith.constant 0 : i32
    %c0_i32_0 = arith.constant 0 : i32
    return %arg0, %c0_i32 : i32, i32
  }
  func.func @transform_4(%arg0: i32) -> (i32, i32) {
    %c0_i32 = arith.constant 0 : i32
    %c0_i32_0 = arith.constant 0 : i32
    return %arg0, %c0_i32 : i32, i32
  }
}

</mosaic_0001>

<bundles_post_ra>
// kernel: tpu_custom_call.1
= control target key start
LH: loop header
LB: loop body
LE: loop exit
PB: predicated region body
PF: predicated region fallthrough
CT: control target
= control target key end

     0   :  { %10 = vsyncpa [#allocation3], 0  ;;  %s667_s15 = smov 0   ;;  %s748_s0 = inlined_call_operand.vmem [shape: f32[3], index: 0, kind: input, shape index: {}]   ;;  %s749_s1 = inlined_call_operand.vmem [shape: bf16[64,128], index: 1, kind: input, shape index: {}]   ;;  %s750_s2 = inlined_call_operand.vmem [shape: bf16[128,64], index: 2, kind: input, shape index: {}]   ;;  %s751_s3 = inlined_call_operand.vmem [shape: f32[64,1], index: 3, kind: output, shape index: {0}]   ;;  %s752_s4 = inlined_call_operand.vmem [shape: f32[64,1], index: 4, kind: output, shape index: {1}]  }
   0x1 LB: > { %s673_s16 = sadd.s32 4294967295, %s639_s15   ;;  %p522_p0 = scmp.ge.s32.totalorder %s639_s15, 1  ;;  %s639_s15 = sphi %s667_s15, %s16_s15  }
   0x2   : > { %p141_p1 = scmp.lt.s32.totalorder %s639_s15, 5  ;;  %s153_s19 = sshll.u32 %s748_s0, 4  ;;  %s154_s19 = int_to_ptr.vmem [resolvable:$true] %s153_s19 }
   0x3   : > { %p595_p3 = scmp.eq.s32.totalorder %s673_s16, 0  ;;  %s641_s20 = smov [#allocation2]  }
   0x4   : > { %p142_p2 = pnand %p522_p0, %p141_p1 }
   0x6   : > { %p591_p4 = pneg %p142_p2  ;;  %178 = sbr.rel (%p142_p2) target bundleno = 565 (0x235), region = 32 }
   0x8   : > { %p592_p5 = pnand %p595_p3, %p591_p4 }
   0xa   : > { %594 = dma.vmem_to_smem (!%p592_p5), %s154_s19, 16, %s641_s20, [#allocation3]  }
   0xb   : > { %634 = dma.done.wait (%p595_p3), [#allocation3], 16  }
   0xc   : > { %636 = vsyncadd (%p595_p3), [#allocation3], 4294967280 }
   0xd   : > { %185 = sfence }
   0xe   : > { %v586_v0 = vld [vmem:[%s750_s2 + $0x38] sm:$0xff]  ;;  %v585_v1 = vld [vmem:[%s750_s2 + $0x30] sm:$0xff]  ;;  %v584_v2 = vld [vmem:[%s750_s2 + $0x28] sm:$0xff]  ;;  %s527_s29 = sshll.u32 %s673_s16, 1  ;;  %v323_v9 = vlaneseq  ;;  %s573_s18 = sshll.u32 %s673_s16, 4  ;;  %vm345_vm2 = vcmask 523264  }
   0xf   : > { %304 = vmatpush.bf16.msra.mxu0 %v586_v0  ;;  %v583_v3 = vld [vmem:[%s750_s2 + $0x20] sm:$0xff]  ;;  %v582_v4 = vld [vmem:[%s750_s2 + $0x18] sm:$0xff]  ;;  %p212_p6 = scmp.lt.s32.totalorder %s527_s29, 7  ;;  %v581_v5 = vld [vmem:[%s750_s2 + $0x10] sm:$0xff]  ;;  %v326_v11 = vstv %s573_s18  ;;  %s229_s16 = sld [smem:[#allocation2]]  ;;  %vm376_vm15 = vcmask 7168  }
  0x10   : > { %v580_v6 = vld [vmem:[%s750_s2 + $0x8] sm:$0xff]  ;;  %v579_v7 = vld [vmem:[%s750_s2] sm:$0xff]  ;;  %v324_v10 = vshrl.u32 %v323_v9, 7  ;;  %v338_v16 = vand.u32 127, %v323_v9  ;;  %s534_s19 = sld [smem:[#allocation2 + $0x2]] }
  0x11   : > { %s754_s29 = smov (!%p212_p6, %s527_s29), 7  ;;  %s533_s20 = sld [smem:[#allocation2 + $0x1]] }
  0x12   : > { %s528_s10 = sshll.u32 %s754_s29, 2  ;;  %v327_v12 = vadd.s32 %v326_v11, %v324_v10  ;;  %v325_v15 = vadd.s32 8, %v324_v10  ;;  %s530_s21 = sshll.u32 %s754_s29, 3 }
  0x13   : > { %305 = vmatpush.bf16.msra.mxu0 %v585_v1  ;;  %s215_s17 = scalar_lea.vmem %s749_s1, %s528_s10  ;;  %s227_s24 = scalar_lea.vmem %s752_s4, %s530_s21 }
  0x14   : > { %v578_v8 = vld [vmem:[%s215_s17] sm:$0xff]  ;;  %v331_v13 = vadd.s32 32, %v327_v12  ;;  %v574_v14 = vadd.s32 4294967264, %v327_v12  ;;  %vm329_vm0 = vcmp.lt.s32.totalorder %v327_v12, 32  ;;  %v328_v18 = vadd.s32 %v326_v11, %v325_v15  ;;  %s221_s27 = scalar_lea.vmem %s751_s3, %s530_s21 }
  0x15   : > { %v356_v30 = vstv %s229_s16  ;;  %vm339_vm5 = vcmp.ne.s32.totalorder %v338_v16, %v327_v12 }
  0x16   : > { %v335_v17 = vsel %vm329_vm0, %v331_v13, %v574_v14  ;;  %v332_v21 = vadd.s32 32, %v328_v18  ;;  %v575_v22 = vadd.s32 4294967264, %v328_v18  ;;  %vm330_vm3 = vcmp.lt.s32.totalorder %v328_v18, 32 }
  0x17   : > { %306 = vmatpush.bf16.msra.mxu0 %v584_v2  ;;  %vm341_vm1 = vcmp.eq.s32.totalorder %v338_v16, %v335_v17  ;;  %v715_v32 = vstv %s534_s19  ;;  %vm340_vm10 = vcmp.ne.s32.totalorder %v338_v16, %v328_v18  ;;  %v373_v53 = vstv %s533_s20 }
  0x18   : > { %v336_v25 = vsel %vm330_vm3, %v332_v21, %v575_v22 }
  0x19   : > { %vm342_vm4 = vcmp.eq.s32.totalorder %v338_v16, %v336_v25 }
  0x1b   : > { %307 = vmatpush.bf16.msra.mxu0 %v583_v3 }
  0x1f   : > { %308 = vmatpush.bf16.msra.mxu0 %v582_v4 }
  0x23   : > { %309 = vmatpush.bf16.msra.mxu0 %v581_v5 }
  0x27   : > { %310 = vmatpush.bf16.msra.mxu0 %v580_v6 }
  0x2b   : > { %311 = vmatpush.bf16.msra.mxu0 %v579_v7 }
  0x2e   : > { %312 = vmatmul.bf16.vlgmr.msra.gmra.mxu0 %v578_v8 }
  0xab   : > { %v313_v19 = vpop.f32.mrf.mxu0 }
  0xac   : > { %v571_v20 = vclamps-f32 %v313_v19, 1.0 }
  0xae   : > { %v343_v23 = vsel %vm341_vm1, %v571_v20, 0.0  ;;  %v357_v31 = vadd.f32 %v571_v20, %v356_v30 }
  0xaf   : > { %v346_v24 = vsel %vm345_vm2, %v343_v23, 0.0 }
  0xb0   : > { %347 = vadd.xlane.f32.xlu0 %v346_v24  ;;  %v379_v35 = vmul.f32 %v571_v20, %v357_v31  ;;  %vm359_vm8 = vcmp.gt.f32.partialorder %v357_v31, 1.0  ;;  %v363_v36 = vmul.f32 %v357_v31, %v357_v31 }
  0xb3   : > { %v315_v26 = vpop.f32.mrf.mxu0 }
  0xb4   : > { %v572_v27 = vclamps-f32 %v315_v26, 1.0 }
  0xb6   : > { %v344_v28 = vsel %vm342_vm4, %v572_v27, 0.0  ;;  %v358_v40 = vadd.f32 %v572_v27, %v356_v30 }
  0xb7   : > { %v349_v29 = vsel %vm345_vm2, %v344_v28, 0.0 }
  0xb8   : > { %350 = vadd.xlane.f32.xlu0 %v349_v29  ;;  %v380_v45 = vmul.f32 %v572_v27, %v358_v40  ;;  %vm360_vm13 = vcmp.gt.f32.partialorder %v358_v40, 1.0  ;;  %v364_v50 = vmul.f32 %v358_v40, %v358_v40 }
 0x123   : > { %v348_v33 = vpop.xlane.xlu0 %347 }
 0x124   : > { %vm352_vm6 = vcmp.gt.f32.partialorder %v571_v20, %v348_v33  ;;  %v718_v34 = vmul.f32 %v715_v32, %v348_v33 }
 0x125   : > { %vm354_vm7 = vmand %vm352_vm6, %vm339_vm5 }
 0x126   : > { %vm361_vm9 = vmand %vm354_vm7, %vm359_vm8  ;;  %v381_v37 = vsel %vm354_vm7, %v379_v35, %v571_v20 }
 0x127   : > { %v365_v38 = vsel %vm361_vm9, %v363_v36, 0.0  ;;  %v384_v39 = vmul.f32 %v715_v32, %v381_v37 }
 0x128   : > { %v367_v41 = vsel %vm345_vm2, %v365_v38, 0.0 }
 0x129   : > { %368 = vadd.xlane.f32.xlu0 %v367_v41  ;;  %v386_v42 = vsel %vm339_vm5, %v384_v39, -1e+30 }
 0x12a   : > { %v388_v43 = vsel %vm345_vm2, %v386_v42, -inf }
 0x12b   : > { %389 = vmax.xlane.f32.xlu1 %v388_v43  ;;  %v351_v44 = vpop.xlane.xlu0 %350 }
 0x12c   : > { %vm353_vm11 = vcmp.gt.f32.partialorder %v572_v27, %v351_v44  ;;  %v413_v12 = vmul.f32 %v715_v32, %v351_v44 }
 0x12d   : > { %vm355_vm12 = vmand %vm353_vm11, %vm340_vm10 }
 0x12e   : > { %v382_v46 = vsel %vm355_vm12, %v380_v45, %v572_v27  ;;  %vm362_vm14 = vmand %vm355_vm12, %vm360_vm13 }
 0x12f   : > { %v385_v47 = vmul.f32 %v715_v32, %v382_v46  ;;  %v366_v51 = vsel %vm362_vm14, %v364_v50, 0.0 }
 0x130   : > { %v370_v52 = vsel %vm345_vm2, %v366_v51, 0.0 }
 0x131   : > { %v387_v48 = vsel %vm340_vm10, %v385_v47, -1e+30 }
 0x132   : > { %v391_v49 = vsel %vm345_vm2, %v387_v48, -inf }
 0x133   : > { %392 = vmax.xlane.f32.xlu1 %v391_v49 }
 0x13b   : > { %371 = vadd.xlane.f32.xlu1 %v370_v52 }
 0x19c   : > { %v369_v54 = vpop.xlane.xlu0 %368 }
 0x19d   : > { %v374_v55 = vmul.f32 %v373_v53, %v369_v54 }
 0x19e   : > { %v390_v56 = vpop.xlane.xlu1 %389 }
 0x19f   : > { %377 = vst.msk [vmem:[%s227_s24] sm:$0xff] %vm376_vm15, %v374_v55  ;;  %v394_v57 = vsub.f32 %v386_v42, %v390_v56 }
 0x1a1   : > { %v396_v58 = vmul.f32 1.442695, %v394_v57 }
 0x1a3   : > { %606 = vpow2.f32 %v396_v58 }
 0x1a6   : > { %v393_v59 = vpop.xlane.xlu1 %392 }
 0x1a7   : > { %v395_v60 = vsub.f32 %v387_v48, %v393_v59 }
 0x1a9   : > { %v607_v61 = vpop.eup %606  ;;  %v398_v62 = vmul.f32 1.442695, %v395_v60 }
 0x1aa   : > { %v400_v63 = vsel %vm345_vm2, %v607_v61, 0.0 }
 0x1ab   : > { %608 = vpow2.f32 %v398_v62  ;;  %401 = vadd.xlane.f32.xlu2 %v400_v63 }
 0x1ae   : > { %v372_v0 = vpop.xlane.xlu1 %371 }
 0x1af   : > { %v375_v1 = vmul.f32 %v373_v53, %v372_v0 }
 0x1b1   : > { %v609_v2 = vpop.eup %608  ;;  %378 = vst.msk [vmem:[%s227_s24 + $0x8] sm:$0xff] %vm376_vm15, %v375_v1 }
 0x1b2   : > { %v403_v3 = vsel %vm345_vm2, %v609_v2, 0.0 }
 0x1b3   : > { %404 = vadd.xlane.f32.xlu2 %v403_v3 }
 0x21e   : > { %v402_v4 = vpop.xlane.xlu2 %401 }
 0x21f   : > { %610 = vlog2.f32 %v402_v4 }
 0x225   : > { %v611_v5 = vpop.eup %610 }
 0x226   : > { %v407_v6 = vmul.f32 0.6931472, %v611_v5  ;;  %v405_v7 = vpop.xlane.xlu2 %404 }
 0x227   : > { %612 = vlog2.f32 %v405_v7 }
 0x228   : > { %v410_v8 = vadd.f32 %v407_v6, %v390_v56 }
 0x22a   : > { %v414_v9 = vsub.f32 %v410_v8, %v718_v34 }
 0x22c   : > { %416 = vst.msk [vmem:[%s221_s27] sm:$0xff] %vm376_vm15, %v414_v9 }
 0x22d   : > { %v613_v10 = vpop.eup %612 }
 0x22e   : > { %v409_v11 = vmul.f32 0.6931472, %v613_v10 }
 0x230   : > { %v411_v13 = vadd.f32 %v409_v11, %v393_v59 }
 0x232   : > { %v415_v14 = vsub.f32 %v411_v13, %v413_v12 }
 0x234   : > { %417 = vst.msk [vmem:[%s221_s27 + $0x8] sm:$0xff] %vm376_vm15, %v415_v14 }
 0x235 PF: > { %s16_s15 = sadd.s32 1, %s639_s15  }
 0x236   : > { %p13_p7 = scmp.ge.s32.totalorder %s16_s15, 6  }
 0x238   :  { %15 = sbr.rel (!%p13_p7) target bundleno = 1 (0x1), region = 79 }
 0x23d   :  { %457 = vsyncpa [#allocation3], 1 }
 0x23e   :  { %459 = vsyncpa [#allocation3 + $0x1], 1 }

</bundles_post_ra>
